<compile_context>
chip_gen: v6e
topology: v6e:2x2x1
jax: 0.10.0
libtpu: 0.0.40
codegen_flags: <defaults>
</compile_context>

<pallas_src>
import math

import numpy as np
import jax
import jax.numpy as jnp
from jax.experimental import pallas as pl
from jax.experimental.pallas import tpu as pltpu
from jax.scipy.special import gammaln

EPS = 1e-10
LANES = 128


def _round_up(a, b):
    return ((a + b - 1) // b) * b


def _make_kernel(ss_dim, coeff_a, coeff_b, coeff_c, lcn_tbl):
    """Kernel body with all mixture constants baked in as immediates."""
    K = len(coeff_a)

    def kernel(x0_ref, x1_ref, out_ref):
        # x0_ref / x1_ref: (tile_rows, 128) counts, samples lane-major.
        x0 = x0_ref[...].astype(jnp.float32)
        x1 = x1_ref[...].astype(jnp.float32)

        # combo = log C(n, x0) + log C(n, x1), exact lookup via unrolled
        # compare/select against the tiny (ss_dim+1)-entry table.
        # TODO(synk): non-integer counts (torch lgamma on arbitrary floats) are not
        # supported by this lookup; counts must be integers in [0, ss_dim].
        combo = jnp.zeros_like(x0)
        for j in range(ss_dim + 1):
            jf = float(j)
            lj = lcn_tbl[j]
            combo = combo + jnp.where(x0 == jf, lj, 0.0) + jnp.where(x1 == jf, lj, 0.0)

        # mixture: sum_k exp(logP_k - log K).  c_k already folds the n*log(1-p)
        # terms and -log K, so each component is 2 FMAs + 1 add (VPU) + 1 exp (EUP).
        mix = jnp.zeros_like(x0)
        for k in range(K):
            mix = mix + jnp.exp(combo + coeff_a[k] * x0 + coeff_b[k] * x1 + coeff_c[k])

        out_ref[...] = jnp.log(mix + EPS)

    return kernel


def mm_bin_forward(x, means, ss_dim, *, tile_rows=512):
    """MM_Bin forward.  x: (N, 2) integer-valued counts in [0, ss_dim] (any float dtype),
    means: (K, 2) concrete array, ss_dim: python int.  Returns (N,) float32."""
    N = int(x.shape[0])
    means_np = np.asarray(means, dtype=np.float64)
    K = int(means_np.shape[0])
    n = float(ss_dim)

    # Per-component constants so that  logP_k(x) - log K = combo + a_k*x0 + b_k*x1 + c_k.
    px = means_np[:, 0] / n
    py = means_np[:, 1] / n
    coeff_a = [float(math.log(px[k]) - math.log1p(-px[k])) for k in range(K)]
    coeff_b = [float(math.log(py[k]) - math.log1p(-py[k])) for k in range(K)]
    coeff_c = [float(n * (math.log1p(-px[k]) + math.log1p(-py[k])) - math.log(K))
               for k in range(K)]
    # log C(n, j) for j = 0..n (exact, tiny table).
    lgn1 = math.lgamma(n + 1.0)
    lcn_tbl = [float(lgn1 - math.lgamma(j + 1.0) - math.lgamma(n - j + 1.0))
               for j in range(ss_dim + 1)]

    # Stream counts as bf16 when exactly representable: halves HBM read bytes.
    in_dtype = jnp.bfloat16 if ss_dim <= 255 else jnp.float32
    row_gran = 16 if in_dtype == jnp.bfloat16 else 8

    # Lane-major layout: pad N to rows_pad * 128, samples fill (sublane, lane) tiles.
    rows = -(-N // LANES)                                   # ceil(N / 128)
    tile_rows = min(tile_rows, _round_up(rows, row_gran))
    tile_rows = max(row_gran, _round_up(tile_rows, row_gran))
    rows_pad = _round_up(rows, tile_rows)
    n_pad = rows_pad * LANES

    xf = jnp.asarray(x, jnp.float32)
    xf = jnp.pad(xf, ((0, n_pad - N), (0, 0)))              # padded samples get x = 0
    x0 = xf[:, 0].reshape(rows_pad, LANES).astype(in_dtype)
    x1 = xf[:, 1].reshape(rows_pad, LANES).astype(in_dtype)

    kernel = _make_kernel(ss_dim, coeff_a, coeff_b, coeff_c, lcn_tbl)

    out = pl.pallas_call(
        kernel,
        out_shape=jax.ShapeDtypeStruct((rows_pad, LANES), jnp.float32),
        grid_spec=pltpu.PrefetchScalarGridSpec(
            num_scalar_prefetch=0,
            grid=(rows_pad // tile_rows,),
            in_specs=[
                pl.BlockSpec((tile_rows, LANES), lambda i: (i, 0)),
                pl.BlockSpec((tile_rows, LANES), lambda i: (i, 0)),
            ],
            out_specs=pl.BlockSpec((tile_rows, LANES), lambda i: (i, 0)),
        ),
        compiler_params=pltpu.CompilerParams(
            dimension_semantics=("parallel",)),
    )(x0, x1)

    return out.reshape(-1)[:N]


def mm_bin_reference(x, means, ss_dim):
    """Pure-JAX reference mirroring the PyTorch per-component loop."""
    n = jnp.float32(ss_dim)
    x = x.astype(jnp.float32)
    K = means.shape[0]
    out = jnp.zeros((x.shape[0],), jnp.float32)
    for k in range(K):
        pxk = means[k, 0] / n
        pyk = means[k, 1] / n
        lp = (gammaln(n + 1.0) - gammaln(x[:, 0] + 1.0) - gammaln(n - x[:, 0] + 1.0)
              + x[:, 0] * jnp.log(pxk) + (n - x[:, 0]) * jnp.log1p(-pxk)
              + gammaln(n + 1.0) - gammaln(x[:, 1] + 1.0) - gammaln(n - x[:, 1] + 1.0)
              + x[:, 1] * jnp.log(pyk) + (n - x[:, 1]) * jnp.log1p(-pyk))
        out = out + jnp.exp(lp) * (1.0 / K)
    return jnp.log(out + EPS)


if __name__ == "__main__":
    key = jax.random.PRNGKey(0)

    ss_dim = 12
    # K = 4 mixture components, means strictly inside (0, ss_dim)
    means = jnp.array([[2.0, 5.0],
                       [7.0, 3.0],
                       [4.0, 9.0],
                       [10.0, 6.0]], dtype=jnp.float32)

    N = 16  # number of samples
    x = jax.random.randint(key, (N, 2), 0, ss_dim + 1).astype(jnp.float32)

    out = mm_bin_forward(x, means, ss_dim)
    out = jax.block_until_ready(out)

    ref = mm_bin_reference(x, means, ss_dim)
    assert out.shape == (N,)
    assert jnp.allclose(out, ref, atol=1e-4, rtol=1e-4), (out, ref)

    print("KERNEL_OK")
</pallas_src>

<mosaic_0001>
module attributes {stable_mosaic.version = 11 : i64} {
  func.func @kernel(%arg0: i32, %arg1: memref<16x128xbf16, #tpu.memory_space<vmem>>, %arg2: memref<16x128xbf16, #tpu.memory_space<vmem>>, %arg3: memref<16x128xf32, #tpu.memory_space<vmem>>) attributes {dimension_semantics = [#tpu.dimension_semantics<parallel>], iteration_bounds = array<i64: 1>, scalar_prefetch = 0 : i64, scratch_operands = 0 : i64, tpu.core_type = #tpu.core_type<tc>, window_params = [{transform_indices = @transform_0, window_bounds = array<i64: 16, 128>}, {transform_indices = @transform_1, window_bounds = array<i64: 16, 128>}, {transform_indices = @transform_2, window_bounds = array<i64: 16, 128>}]} {
    %c0 = arith.constant 0 : index
    %c0_0 = arith.constant 0 : index
    %0 = vector.load %arg1[%c0, %c0_0] : memref<16x128xbf16, #tpu.memory_space<vmem>>, vector<16x128xbf16>
    %1 = arith.extf %0 : vector<16x128xbf16> to vector<16x128xf32>
    %c0_1 = arith.constant 0 : index
    %c0_2 = arith.constant 0 : index
    %2 = vector.load %arg2[%c0_1, %c0_2] : memref<16x128xbf16, #tpu.memory_space<vmem>>, vector<16x128xbf16>
    %3 = arith.extf %2 : vector<16x128xbf16> to vector<16x128xf32>
    %cst = arith.constant 0.000000e+00 : f32
    %4 = vector.broadcast %cst : f32 to vector<16x128xf32>
    %cst_3 = arith.constant 0.000000e+00 : f32
    %5 = vector.broadcast %cst_3 : f32 to vector<16x128xf32>
    %6 = arith.cmpf oeq, %1, %5 : vector<16x128xf32>
    %cst_4 = arith.constant 0.000000e+00 : f32
    %cst_5 = arith.constant 0.000000e+00 : f32
    %7 = vector.broadcast %cst_4 : f32 to vector<16x128xf32>
    %8 = vector.broadcast %cst_5 : f32 to vector<16x128xf32>
    %9 = arith.select %6, %7, %8 : vector<16x128xi1>, vector<16x128xf32>
    %10 = arith.addf %4, %9 : vector<16x128xf32>
    %cst_6 = arith.constant 0.000000e+00 : f32
    %11 = vector.broadcast %cst_6 : f32 to vector<16x128xf32>
    %12 = arith.cmpf oeq, %3, %11 : vector<16x128xf32>
    %cst_7 = arith.constant 0.000000e+00 : f32
    %cst_8 = arith.constant 0.000000e+00 : f32
    %13 = vector.broadcast %cst_7 : f32 to vector<16x128xf32>
    %14 = vector.broadcast %cst_8 : f32 to vector<16x128xf32>
    %15 = arith.select %12, %13, %14 : vector<16x128xi1>, vector<16x128xf32>
    %16 = arith.addf %10, %15 : vector<16x128xf32>
    %cst_9 = arith.constant 1.000000e+00 : f32
    %17 = vector.broadcast %cst_9 : f32 to vector<16x128xf32>
    %18 = arith.cmpf oeq, %1, %17 : vector<16x128xf32>
    %cst_10 = arith.constant 2.48490667 : f32
    %cst_11 = arith.constant 0.000000e+00 : f32
    %19 = vector.broadcast %cst_10 : f32 to vector<16x128xf32>
    %20 = vector.broadcast %cst_11 : f32 to vector<16x128xf32>
    %21 = arith.select %18, %19, %20 : vector<16x128xi1>, vector<16x128xf32>
    %22 = arith.addf %16, %21 : vector<16x128xf32>
    %cst_12 = arith.constant 1.000000e+00 : f32
    %23 = vector.broadcast %cst_12 : f32 to vector<16x128xf32>
    %24 = arith.cmpf oeq, %3, %23 : vector<16x128xf32>
    %cst_13 = arith.constant 2.48490667 : f32
    %cst_14 = arith.constant 0.000000e+00 : f32
    %25 = vector.broadcast %cst_13 : f32 to vector<16x128xf32>
    %26 = vector.broadcast %cst_14 : f32 to vector<16x128xf32>
    %27 = arith.select %24, %25, %26 : vector<16x128xi1>, vector<16x128xf32>
    %28 = arith.addf %22, %27 : vector<16x128xf32>
    %cst_15 = arith.constant 2.000000e+00 : f32
    %29 = vector.broadcast %cst_15 : f32 to vector<16x128xf32>
    %30 = arith.cmpf oeq, %1, %29 : vector<16x128xf32>
    %cst_16 = arith.constant 4.18965483 : f32
    %cst_17 = arith.constant 0.000000e+00 : f32
    %31 = vector.broadcast %cst_16 : f32 to vector<16x128xf32>
    %32 = vector.broadcast %cst_17 : f32 to vector<16x128xf32>
    %33 = arith.select %30, %31, %32 : vector<16x128xi1>, vector<16x128xf32>
    %34 = arith.addf %28, %33 : vector<16x128xf32>
    %cst_18 = arith.constant 2.000000e+00 : f32
    %35 = vector.broadcast %cst_18 : f32 to vector<16x128xf32>
    %36 = arith.cmpf oeq, %3, %35 : vector<16x128xf32>
    %cst_19 = arith.constant 4.18965483 : f32
    %cst_20 = arith.constant 0.000000e+00 : f32
    %37 = vector.broadcast %cst_19 : f32 to vector<16x128xf32>
    %38 = vector.broadcast %cst_20 : f32 to vector<16x128xf32>
    %39 = arith.select %36, %37, %38 : vector<16x128xi1>, vector<16x128xf32>
    %40 = arith.addf %34, %39 : vector<16x128xf32>
    %cst_21 = arith.constant 3.000000e+00 : f32
    %41 = vector.broadcast %cst_21 : f32 to vector<16x128xf32>
    %42 = arith.cmpf oeq, %1, %41 : vector<16x128xf32>
    %cst_22 = arith.constant 5.39362764 : f32
    %cst_23 = arith.constant 0.000000e+00 : f32
    %43 = vector.broadcast %cst_22 : f32 to vector<16x128xf32>
    %44 = vector.broadcast %cst_23 : f32 to vector<16x128xf32>
    %45 = arith.select %42, %43, %44 : vector<16x128xi1>, vector<16x128xf32>
    %46 = arith.addf %40, %45 : vector<16x128xf32>
    %cst_24 = arith.constant 3.000000e+00 : f32
    %47 = vector.broadcast %cst_24 : f32 to vector<16x128xf32>
    %48 = arith.cmpf oeq, %3, %47 : vector<16x128xf32>
    %cst_25 = arith.constant 5.39362764 : f32
    %cst_26 = arith.constant 0.000000e+00 : f32
    %49 = vector.broadcast %cst_25 : f32 to vector<16x128xf32>
    %50 = vector.broadcast %cst_26 : f32 to vector<16x128xf32>
    %51 = arith.select %48, %49, %50 : vector<16x128xi1>, vector<16x128xf32>
    %52 = arith.addf %46, %51 : vector<16x128xf32>
    %cst_27 = arith.constant 4.000000e+00 : f32
    %53 = vector.broadcast %cst_27 : f32 to vector<16x128xf32>
    %54 = arith.cmpf oeq, %1, %53 : vector<16x128xf32>
    %cst_28 = arith.constant 6.2045579 : f32
    %cst_29 = arith.constant 0.000000e+00 : f32
    %55 = vector.broadcast %cst_28 : f32 to vector<16x128xf32>
    %56 = vector.broadcast %cst_29 : f32 to vector<16x128xf32>
    %57 = arith.select %54, %55, %56 : vector<16x128xi1>, vector<16x128xf32>
    %58 = arith.addf %52, %57 : vector<16x128xf32>
    %cst_30 = arith.constant 4.000000e+00 : f32
    %59 = vector.broadcast %cst_30 : f32 to vector<16x128xf32>
    %60 = arith.cmpf oeq, %3, %59 : vector<16x128xf32>
    %cst_31 = arith.constant 6.2045579 : f32
    %cst_32 = arith.constant 0.000000e+00 : f32
    %61 = vector.broadcast %cst_31 : f32 to vector<16x128xf32>
    %62 = vector.broadcast %cst_32 : f32 to vector<16x128xf32>
    %63 = arith.select %60, %61, %62 : vector<16x128xi1>, vector<16x128xf32>
    %64 = arith.addf %58, %63 : vector<16x128xf32>
    %cst_33 = arith.constant 5.000000e+00 : f32
    %65 = vector.broadcast %cst_33 : f32 to vector<16x128xf32>
    %66 = arith.cmpf oeq, %1, %65 : vector<16x128xf32>
    %cst_34 = arith.constant 6.6745615 : f32
    %cst_35 = arith.constant 0.000000e+00 : f32
    %67 = vector.broadcast %cst_34 : f32 to vector<16x128xf32>
    %68 = vector.broadcast %cst_35 : f32 to vector<16x128xf32>
    %69 = arith.select %66, %67, %68 : vector<16x128xi1>, vector<16x128xf32>
    %70 = arith.addf %64, %69 : vector<16x128xf32>
    %cst_36 = arith.constant 5.000000e+00 : f32
    %71 = vector.broadcast %cst_36 : f32 to vector<16x128xf32>
    %72 = arith.cmpf oeq, %3, %71 : vector<16x128xf32>
    %cst_37 = arith.constant 6.6745615 : f32
    %cst_38 = arith.constant 0.000000e+00 : f32
    %73 = vector.broadcast %cst_37 : f32 to vector<16x128xf32>
    %74 = vector.broadcast %cst_38 : f32 to vector<16x128xf32>
    %75 = arith.select %72, %73, %74 : vector<16x128xi1>, vector<16x128xf32>
    %76 = arith.addf %70, %75 : vector<16x128xf32>
    %cst_39 = arith.constant 6.000000e+00 : f32
    %77 = vector.broadcast %cst_39 : f32 to vector<16x128xf32>
    %78 = arith.cmpf oeq, %1, %77 : vector<16x128xf32>
    %cst_40 = arith.constant 6.82871199 : f32
    %cst_41 = arith.constant 0.000000e+00 : f32
    %79 = vector.broadcast %cst_40 : f32 to vector<16x128xf32>
    %80 = vector.broadcast %cst_41 : f32 to vector<16x128xf32>
    %81 = arith.select %78, %79, %80 : vector<16x128xi1>, vector<16x128xf32>
    %82 = arith.addf %76, %81 : vector<16x128xf32>
    %cst_42 = arith.constant 6.000000e+00 : f32
    %83 = vector.broadcast %cst_42 : f32 to vector<16x128xf32>
    %84 = arith.cmpf oeq, %3, %83 : vector<16x128xf32>
    %cst_43 = arith.constant 6.82871199 : f32
    %cst_44 = arith.constant 0.000000e+00 : f32
    %85 = vector.broadcast %cst_43 : f32 to vector<16x128xf32>
    %86 = vector.broadcast %cst_44 : f32 to vector<16x128xf32>
    %87 = arith.select %84, %85, %86 : vector<16x128xi1>, vector<16x128xf32>
    %88 = arith.addf %82, %87 : vector<16x128xf32>
    %cst_45 = arith.constant 7.000000e+00 : f32
    %89 = vector.broadcast %cst_45 : f32 to vector<16x128xf32>
    %90 = arith.cmpf oeq, %1, %89 : vector<16x128xf32>
    %cst_46 = arith.constant 6.6745615 : f32
    %cst_47 = arith.constant 0.000000e+00 : f32
    %91 = vector.broadcast %cst_46 : f32 to vector<16x128xf32>
    %92 = vector.broadcast %cst_47 : f32 to vector<16x128xf32>
    %93 = arith.select %90, %91, %92 : vector<16x128xi1>, vector<16x128xf32>
    %94 = arith.addf %88, %93 : vector<16x128xf32>
    %cst_48 = arith.constant 7.000000e+00 : f32
    %95 = vector.broadcast %cst_48 : f32 to vector<16x128xf32>
    %96 = arith.cmpf oeq, %3, %95 : vector<16x128xf32>
    %cst_49 = arith.constant 6.6745615 : f32
    %cst_50 = arith.constant 0.000000e+00 : f32
    %97 = vector.broadcast %cst_49 : f32 to vector<16x128xf32>
    %98 = vector.broadcast %cst_50 : f32 to vector<16x128xf32>
    %99 = arith.select %96, %97, %98 : vector<16x128xi1>, vector<16x128xf32>
    %100 = arith.addf %94, %99 : vector<16x128xf32>
    %cst_51 = arith.constant 8.000000e+00 : f32
    %101 = vector.broadcast %cst_51 : f32 to vector<16x128xf32>
    %102 = arith.cmpf oeq, %1, %101 : vector<16x128xf32>
    %cst_52 = arith.constant 6.2045579 : f32
    %cst_53 = arith.constant 0.000000e+00 : f32
    %103 = vector.broadcast %cst_52 : f32 to vector<16x128xf32>
    %104 = vector.broadcast %cst_53 : f32 to vector<16x128xf32>
    %105 = arith.select %102, %103, %104 : vector<16x128xi1>, vector<16x128xf32>
    %106 = arith.addf %100, %105 : vector<16x128xf32>
    %cst_54 = arith.constant 8.000000e+00 : f32
    %107 = vector.broadcast %cst_54 : f32 to vector<16x128xf32>
    %108 = arith.cmpf oeq, %3, %107 : vector<16x128xf32>
    %cst_55 = arith.constant 6.2045579 : f32
    %cst_56 = arith.constant 0.000000e+00 : f32
    %109 = vector.broadcast %cst_55 : f32 to vector<16x128xf32>
    %110 = vector.broadcast %cst_56 : f32 to vector<16x128xf32>
    %111 = arith.select %108, %109, %110 : vector<16x128xi1>, vector<16x128xf32>
    %112 = arith.addf %106, %111 : vector<16x128xf32>
    %cst_57 = arith.constant 9.000000e+00 : f32
    %113 = vector.broadcast %cst_57 : f32 to vector<16x128xf32>
    %114 = arith.cmpf oeq, %1, %113 : vector<16x128xf32>
    %cst_58 = arith.constant 5.39362764 : f32
    %cst_59 = arith.constant 0.000000e+00 : f32
    %115 = vector.broadcast %cst_58 : f32 to vector<16x128xf32>
    %116 = vector.broadcast %cst_59 : f32 to vector<16x128xf32>
    %117 = arith.select %114, %115, %116 : vector<16x128xi1>, vector<16x128xf32>
    %118 = arith.addf %112, %117 : vector<16x128xf32>
    %cst_60 = arith.constant 9.000000e+00 : f32
    %119 = vector.broadcast %cst_60 : f32 to vector<16x128xf32>
    %120 = arith.cmpf oeq, %3, %119 : vector<16x128xf32>
    %cst_61 = arith.constant 5.39362764 : f32
    %cst_62 = arith.constant 0.000000e+00 : f32
    %121 = vector.broadcast %cst_61 : f32 to vector<16x128xf32>
    %122 = vector.broadcast %cst_62 : f32 to vector<16x128xf32>
    %123 = arith.select %120, %121, %122 : vector<16x128xi1>, vector<16x128xf32>
    %124 = arith.addf %118, %123 : vector<16x128xf32>
    %cst_63 = arith.constant 1.000000e+01 : f32
    %125 = vector.broadcast %cst_63 : f32 to vector<16x128xf32>
    %126 = arith.cmpf oeq, %1, %125 : vector<16x128xf32>
    %cst_64 = arith.constant 4.18965483 : f32
    %cst_65 = arith.constant 0.000000e+00 : f32
    %127 = vector.broadcast %cst_64 : f32 to vector<16x128xf32>
    %128 = vector.broadcast %cst_65 : f32 to vector<16x128xf32>
    %129 = arith.select %126, %127, %128 : vector<16x128xi1>, vector<16x128xf32>
    %130 = arith.addf %124, %129 : vector<16x128xf32>
    %cst_66 = arith.constant 1.000000e+01 : f32
    %131 = vector.broadcast %cst_66 : f32 to vector<16x128xf32>
    %132 = arith.cmpf oeq, %3, %131 : vector<16x128xf32>
    %cst_67 = arith.constant 4.18965483 : f32
    %cst_68 = arith.constant 0.000000e+00 : f32
    %133 = vector.broadcast %cst_67 : f32 to vector<16x128xf32>
    %134 = vector.broadcast %cst_68 : f32 to vector<16x128xf32>
    %135 = arith.select %132, %133, %134 : vector<16x128xi1>, vector<16x128xf32>
    %136 = arith.addf %130, %135 : vector<16x128xf32>
    %cst_69 = arith.constant 1.100000e+01 : f32
    %137 = vector.broadcast %cst_69 : f32 to vector<16x128xf32>
    %138 = arith.cmpf oeq, %1, %137 : vector<16x128xf32>
    %cst_70 = arith.constant 2.48490667 : f32
    %cst_71 = arith.constant 0.000000e+00 : f32
    %139 = vector.broadcast %cst_70 : f32 to vector<16x128xf32>
    %140 = vector.broadcast %cst_71 : f32 to vector<16x128xf32>
    %141 = arith.select %138, %139, %140 : vector<16x128xi1>, vector<16x128xf32>
    %142 = arith.addf %136, %141 : vector<16x128xf32>
    %cst_72 = arith.constant 1.100000e+01 : f32
    %143 = vector.broadcast %cst_72 : f32 to vector<16x128xf32>
    %144 = arith.cmpf oeq, %3, %143 : vector<16x128xf32>
    %cst_73 = arith.constant 2.48490667 : f32
    %cst_74 = arith.constant 0.000000e+00 : f32
    %145 = vector.broadcast %cst_73 : f32 to vector<16x128xf32>
    %146 = vector.broadcast %cst_74 : f32 to vector<16x128xf32>
    %147 = arith.select %144, %145, %146 : vector<16x128xi1>, vector<16x128xf32>
    %148 = arith.addf %142, %147 : vector<16x128xf32>
    %cst_75 = arith.constant 1.200000e+01 : f32
    %149 = vector.broadcast %cst_75 : f32 to vector<16x128xf32>
    %150 = arith.cmpf oeq, %1, %149 : vector<16x128xf32>
    %cst_76 = arith.constant 0.000000e+00 : f32
    %cst_77 = arith.constant 0.000000e+00 : f32
    %151 = vector.broadcast %cst_76 : f32 to vector<16x128xf32>
    %152 = vector.broadcast %cst_77 : f32 to vector<16x128xf32>
    %153 = arith.select %150, %151, %152 : vector<16x128xi1>, vector<16x128xf32>
    %154 = arith.addf %148, %153 : vector<16x128xf32>
    %cst_78 = arith.constant 1.200000e+01 : f32
    %155 = vector.broadcast %cst_78 : f32 to vector<16x128xf32>
    %156 = arith.cmpf oeq, %3, %155 : vector<16x128xf32>
    %cst_79 = arith.constant 0.000000e+00 : f32
    %cst_80 = arith.constant 0.000000e+00 : f32
    %157 = vector.broadcast %cst_79 : f32 to vector<16x128xf32>
    %158 = vector.broadcast %cst_80 : f32 to vector<16x128xf32>
    %159 = arith.select %156, %157, %158 : vector<16x128xi1>, vector<16x128xf32>
    %160 = arith.addf %154, %159 : vector<16x128xf32>
    %cst_81 = arith.constant 0.000000e+00 : f32
    %161 = vector.broadcast %cst_81 : f32 to vector<16x128xf32>
    %cst_82 = arith.constant -1.60943794 : f32
    %162 = vector.broadcast %cst_82 : f32 to vector<16x128xf32>
    %163 = arith.mulf %162, %1 : vector<16x128xf32>
    %164 = arith.addf %160, %163 : vector<16x128xf32>
    %cst_83 = arith.constant -0.336472243 : f32
    %165 = vector.broadcast %cst_83 : f32 to vector<16x128xf32>
    %166 = arith.mulf %165, %3 : vector<16x128xf32>
    %167 = arith.addf %164, %166 : vector<16x128xf32>
    %cst_84 = arith.constant -10.0421114 : f32
    %168 = vector.broadcast %cst_84 : f32 to vector<16x128xf32>
    %169 = arith.addf %167, %168 : vector<16x128xf32>
    %170 = math.exp %169 : vector<16x128xf32>
    %171 = arith.addf %161, %170 : vector<16x128xf32>
    %cst_85 = arith.constant 0.336472243 : f32
    %172 = vector.broadcast %cst_85 : f32 to vector<16x128xf32>
    %173 = arith.mulf %172, %1 : vector<16x128xf32>
    %174 = arith.addf %160, %173 : vector<16x128xf32>
    %cst_86 = arith.constant -1.09861231 : f32
    %175 = vector.broadcast %cst_86 : f32 to vector<16x128xf32>
    %176 = arith.mulf %175, %3 : vector<16x128xf32>
    %177 = arith.addf %174, %176 : vector<16x128xf32>
    %cst_87 = arith.constant -15.3441038 : f32
    %178 = vector.broadcast %cst_87 : f32 to vector<16x128xf32>
    %179 = arith.addf %177, %178 : vector<16x128xf32>
    %180 = math.exp %179 : vector<16x128xf32>
    %181 = arith.addf %171, %180 : vector<16x128xf32>
    %cst_88 = arith.constant -0.693147182 : f32
    %182 = vector.broadcast %cst_88 : f32 to vector<16x128xf32>
    %183 = arith.mulf %182, %1 : vector<16x128xf32>
    %184 = arith.addf %160, %183 : vector<16x128xf32>
    %cst_89 = arith.constant 1.09861231 : f32
    %185 = vector.broadcast %cst_89 : f32 to vector<16x128xf32>
    %186 = arith.mulf %185, %3 : vector<16x128xf32>
    %187 = arith.addf %184, %186 : vector<16x128xf32>
    %cst_90 = arith.constant -22.8874073 : f32
    %188 = vector.broadcast %cst_90 : f32 to vector<16x128xf32>
    %189 = arith.addf %187, %188 : vector<16x128xf32>
    %190 = math.exp %189 : vector<16x128xf32>
    %191 = arith.addf %181, %190 : vector<16x128xf32>
    %cst_91 = arith.constant 1.60943794 : f32
    %192 = vector.broadcast %cst_91 : f32 to vector<16x128xf32>
    %193 = arith.mulf %192, %1 : vector<16x128xf32>
    %194 = arith.addf %160, %193 : vector<16x128xf32>
    %cst_92 = arith.constant 0.000000e+00 : f32
    %195 = vector.broadcast %cst_92 : f32 to vector<16x128xf32>
    %196 = arith.mulf %195, %3 : vector<16x128xf32>
    %197 = arith.addf %194, %196 : vector<16x128xf32>
    %cst_93 = arith.constant -31.2051735 : f32
    %198 = vector.broadcast %cst_93 : f32 to vector<16x128xf32>
    %199 = arith.addf %197, %198 : vector<16x128xf32>
    %200 = math.exp %199 : vector<16x128xf32>
    %201 = arith.addf %191, %200 : vector<16x128xf32>
    %cst_94 = arith.constant 1.000000e-10 : f32
    %202 = vector.broadcast %cst_94 : f32 to vector<16x128xf32>
    %203 = arith.addf %201, %202 : vector<16x128xf32>
    %204 = math.log %203 : vector<16x128xf32>
    %c0_95 = arith.constant 0 : index
    %c0_96 = arith.constant 0 : index
    %205 = vector.load %arg3[%c0_95, %c0_96] : memref<16x128xf32, #tpu.memory_space<vmem>>, vector<16x128xf32>
    tpu.vector_store %arg3[%c0_95, %c0_96], %204 {strides = array<i32>} : memref<16x128xf32, #tpu.memory_space<vmem>>, vector<16x128xf32>,
    return
  }
  func.func @transform_0(%arg0: i32) -> (i32, i32) {
    %c0_i32 = arith.constant 0 : i32
    %c0_i32_0 = arith.constant 0 : i32
    return %arg0, %c0_i32 : i32, i32
  }
  func.func @transform_1(%arg0: i32) -> (i32, i32) {
    %c0_i32 = arith.constant 0 : i32
    %c0_i32_0 = arith.constant 0 : i32
    return %arg0, %c0_i32 : i32, i32
  }
  func.func @transform_2(%arg0: i32) -> (i32, i32) {
    %c0_i32 = arith.constant 0 : i32
    %c0_i32_0 = arith.constant 0 : i32
    return %arg0, %c0_i32 : i32, i32
  }
}

</mosaic_0001>

<bundles_post_ra>
// kernel: tpu_custom_call.1
= control target key start
LH: loop header
LB: loop body
LE: loop exit
PB: predicated region body
PF: predicated region fallthrough
CT: control target
= control target key end

     0   :  { %7 = vsyncpa [#allocation3], 0  ;;  %s522_s0 = inlined_call_operand.hbm [shape: bf16[16,128], index: 0, kind: input, shape index: {}]   ;;  %s523_s1 = inlined_call_operand.hbm [shape: bf16[16,128], index: 1, kind: input, shape index: {}]   ;;  %s524_s2 = inlined_call_operand.hbm [shape: f32[16,128], index: 2, kind: output, shape index: {}]  }
   0x1   :  { %8 = vsyncpa [#allocation6], 0 }
   0x2   :  { %9 = vsyncpa [#allocation4], 0  ;;  %s376_s9 = smov [#allocation2]  }
   0x3   :  { %s15_s10 = sshll.u32 %s376_s9, 4  ;;  %s16_s10 = int_to_ptr.vmem [resolvable:$true] %s15_s10 }
   0x4   :  { %s318_s11 = scalar_lea.vmem %s16_s10, 128  ;;  %p323_p1 = scmp.lt.s32.totalorder %s16_s10, %s16_s10 }
   0x5   :  { %p319_p0 = scmp.ne.s32.totalorder %s16_s10, %s318_s11  ;;  %p324_p2 = scmp.lt.s32.totalorder %s318_s11, %s318_s11 }
   0x7   :  { %p325_p3 = por %p324_p2, %p323_p1 }
   0x9   :  { %p326_p4 = pnand %p325_p3, %p319_p0 }
   0xb   :  { %329 = shalt.err (!%p326_p4)
}
   0xc   :  { %s377_s12 = smov 64   ;;  %s378_s13 = smov 4  }
   0xd   :  { %21 = dma.hbm_to_vmem [thread:$0]  %s522_s0, 128, %s16_s10, [#allocation3], %s377_s12, %s377_s12, %s378_s13  }
   0xe   :  { %s379_s16 = smov [#allocation5]  }
   0xf   :  { %s27_s17 = sshll.u32 %s379_s16, 4  ;;  %s28_s17 = int_to_ptr.vmem [resolvable:$true] %s27_s17 }
  0x10   :  { %s338_s18 = scalar_lea.vmem %s28_s17, 128  ;;  %p343_p6 = scmp.lt.s32.totalorder %s28_s17, %s28_s17 }
  0x11   :  { %p339_p5 = scmp.ne.s32.totalorder %s28_s17, %s338_s18  ;;  %p344_p7 = scmp.lt.s32.totalorder %s338_s18, %s338_s18 }
  0x13   :  { %p345_p8 = por %p344_p7, %p343_p6 }
  0x15   :  { %p346_p9 = pnand %p345_p8, %p339_p5 }
  0x17   :  { %349 = shalt.err (!%p346_p9)
}
  0x18   :  { %33 = dma.hbm_to_vmem [thread:$0]  %s523_s1, 128, %s28_s17, [#allocation6], %s377_s12, %s377_s12, %s378_s13  }
  0x19   :  { %370 = dma.done.wait [#allocation3], 128  }
  0x1a   :  { %371 = vsyncadd [#allocation3], 4294967168 }
  0x1b   :  { %372 = dma.done.wait [#allocation6], 128  }
  0x1c   :  { %373 = vsyncadd [#allocation6], 4294967168  ;;  %v275_v0 = vld [vmem:[#allocation2] sm:$0xff]   ;;  %v279_v1 = vld [vmem:[#allocation5] sm:$0xff]   ;;  %v380_v4 = vmov 0.0   ;;  %s381_s0 = smov [#allocation7]  }
  0x1d   :  { %v405_v2 = vunpack.c.l.bf16 %v275_v0  ;;  %v407_v3 = vunpack.c.l.bf16 %v279_v1  ;;  %v425_v17 = vunpack.c.h.bf16 %v275_v0  ;;  %v427_v18 = vunpack.c.h.bf16 %v279_v1  ;;  %s261_s1 = sshll.u32 %s381_s0, 4  ;;  %s262_s1 = int_to_ptr.vmem [resolvable:$true] %s261_s1 }
  0x1e   :  { %s350_s21 = scalar_lea.vmem %s262_s1, 256  ;;  %p355_p11 = scmp.lt.s32.totalorder %s262_s1, %s262_s1 }
  0x1f   :  { %vm48_vm0 = vcmp.eq.f32.partialorder %v405_v2, 1.0  ;;  %vm54_vm1 = vcmp.eq.f32.partialorder %v407_v3, 1.0  ;;  %vm60_vm2 = vcmp.eq.f32.partialorder %v405_v2, 2.0  ;;  %vm66_vm3 = vcmp.eq.f32.partialorder %v407_v3, 2.0  ;;  %p351_p10 = scmp.ne.s32.totalorder %s262_s1, %s350_s21  ;;  %p356_p12 = scmp.lt.s32.totalorder %s350_s21, %s350_s21 }
  0x20   :  { %v50_v5 = vsel %vm48_vm0, 2.4849067, %v380_v4  ;;  %v56_v6 = vsel %vm54_vm1, 2.4849067, %v380_v4  ;;  %v62_v7 = vsel %vm60_vm2, 4.189655, %v380_v4 }
  0x21   :  { %v58_v8 = vadd.f32 %v56_v6, %v50_v5  ;;  %vm72_vm4 = vcmp.eq.f32.partialorder %v405_v2, 3.0  ;;  %v68_v9 = vsel %vm66_vm3, 4.189655, %v380_v4  ;;  %vm78_vm5 = vcmp.eq.f32.partialorder %v407_v3, 3.0  ;;  %p357_p13 = por %p356_p12, %p355_p11 }
  0x22   :  { %v74_v11 = vsel %vm72_vm4, 5.3936276, %v380_v4  ;;  %vm84_vm6 = vcmp.eq.f32.partialorder %v405_v2, 4.0  ;;  %v80_v13 = vsel %vm78_vm5, 5.3936276, %v380_v4  ;;  %vm90_vm7 = vcmp.eq.f32.partialorder %v407_v3, 4.0 }
  0x23   :  { %v64_v10 = vadd.f32 %v62_v7, %v58_v8  ;;  %v86_v15 = vsel %vm84_vm6, 6.204558, %v380_v4  ;;  %vm96_vm8 = vcmp.eq.f32.partialorder %v405_v2, 5.0  ;;  %v92_v19 = vsel %vm90_vm7, 6.204558, %v380_v4  ;;  %p358_p0 = pnand %p357_p13, %p351_p10 }
  0x24   :  { %vm102_vm9 = vcmp.eq.f32.partialorder %v407_v3, 5.0  ;;  %v98_v21 = vsel %vm96_vm8, 6.6745615, %v380_v4  ;;  %vm108_vm10 = vcmp.eq.f32.partialorder %v405_v2, 6.0  ;;  %vm114_vm11 = vcmp.eq.f32.partialorder %v407_v3, 6.0 }
  0x25   :  { %v70_v12 = vadd.f32 %v68_v9, %v64_v10  ;;  %v104_v23 = vsel %vm102_vm9, 6.6745615, %v380_v4  ;;  %vm49_vm12 = vcmp.eq.f32.partialorder %v425_v17, 1.0  ;;  %vm55_vm13 = vcmp.eq.f32.partialorder %v427_v18, 1.0 }
  0x26   :  { %vm61_vm14 = vcmp.eq.f32.partialorder %v425_v17, 2.0  ;;  %v51_v25 = vsel %vm49_vm12, 2.4849067, %v380_v4  ;;  %v57_v26 = vsel %vm55_vm13, 2.4849067, %v380_v4  ;;  %vm67_vm15 = vcmp.eq.f32.partialorder %v427_v18, 2.0 }
  0x27   :  { %v76_v14 = vadd.f32 %v74_v11, %v70_v12  ;;  %v63_v27 = vsel %vm61_vm14, 4.189655, %v380_v4  ;;  %v110_v28 = vsel %vm108_vm10, 6.828712, %v380_v4  ;;  %v59_v29 = vadd.f32 %v57_v26, %v51_v25 }
  0x28   :  { %vm73_vm0 = vcmp.eq.f32.partialorder %v425_v17, 3.0  ;;  %vm120_vm1 = vcmp.eq.f32.partialorder %v405_v2, 7.0  ;;  %v69_v31 = vsel %vm67_vm15, 4.189655, %v380_v4  ;;  %v116_v32 = vsel %vm114_vm11, 6.828712, %v380_v4 }
  0x29   :  { %v82_v16 = vadd.f32 %v80_v13, %v76_v14  ;;  %v65_v33 = vadd.f32 %v63_v27, %v59_v29  ;;  %vm79_vm2 = vcmp.eq.f32.partialorder %v427_v18, 3.0  ;;  %vm126_vm3 = vcmp.eq.f32.partialorder %v407_v3, 7.0 }
  0x2a   :  { %v75_v35 = vsel %vm73_vm0, 5.3936276, %v380_v4  ;;  %v122_v36 = vsel %vm120_vm1, 6.6745615, %v380_v4  ;;  %vm85_vm4 = vcmp.eq.f32.partialorder %v425_v17, 4.0  ;;  %vm132_vm5 = vcmp.eq.f32.partialorder %v405_v2, 8.0 }
  0x2b   :  { %v88_v20 = vadd.f32 %v86_v15, %v82_v16  ;;  %v71_v37 = vadd.f32 %v69_v31, %v65_v33  ;;  %v81_v39 = vsel %vm79_vm2, 5.3936276, %v380_v4  ;;  %v128_v40 = vsel %vm126_vm3, 6.6745615, %v380_v4 }
  0x2c   :  { %vm91_vm6 = vcmp.eq.f32.partialorder %v427_v18, 4.0  ;;  %vm138_vm7 = vcmp.eq.f32.partialorder %v407_v3, 8.0  ;;  %v87_v43 = vsel %vm85_vm4, 6.204558, %v380_v4  ;;  %v134_v44 = vsel %vm132_vm5, 6.204558, %v380_v4 }
  0x2d   :  { %v94_v22 = vadd.f32 %v92_v19, %v88_v20  ;;  %v77_v41 = vadd.f32 %v75_v35, %v71_v37  ;;  %vm97_vm8 = vcmp.eq.f32.partialorder %v425_v17, 5.0  ;;  %vm144_vm9 = vcmp.eq.f32.partialorder %v405_v2, 9.0 }
  0x2e   :  { %v93_v47 = vsel %vm91_vm6, 6.204558, %v380_v4  ;;  %v140_v48 = vsel %vm138_vm7, 6.204558, %v380_v4  ;;  %vm103_vm10 = vcmp.eq.f32.partialorder %v427_v18, 5.0  ;;  %vm150_vm11 = vcmp.eq.f32.partialorder %v407_v3, 9.0 }
  0x2f   :  { %v100_v24 = vadd.f32 %v98_v21, %v94_v22  ;;  %v83_v45 = vadd.f32 %v81_v39, %v77_v41  ;;  %v99_v51 = vsel %vm97_vm8, 6.6745615, %v380_v4  ;;  %v146_v52 = vsel %vm144_vm9, 5.3936276, %v380_v4 }
  0x30   :  { %vm109_vm12 = vcmp.eq.f32.partialorder %v425_v17, 6.0  ;;  %vm156_vm13 = vcmp.eq.f32.partialorder %v405_v2, 10.0  ;;  %v105_v55 = vsel %vm103_vm10, 6.6745615, %v380_v4  ;;  %v152_v56 = vsel %vm150_vm11, 5.3936276, %v380_v4 }
  0x31   :  { %v106_v30 = vadd.f32 %v104_v23, %v100_v24  ;;  %v89_v49 = vadd.f32 %v87_v43, %v83_v45  ;;  %vm115_vm14 = vcmp.eq.f32.partialorder %v427_v18, 6.0  ;;  %vm162_vm15 = vcmp.eq.f32.partialorder %v407_v3, 10.0 }
  0x32   :  { %v111_v59 = vsel %vm109_vm12, 6.828712, %v380_v4  ;;  %v158_v60 = vsel %vm156_vm13, 4.189655, %v380_v4  ;;  %vm121_vm0 = vcmp.eq.f32.partialorder %v425_v17, 7.0  ;;  %vm168_vm1 = vcmp.eq.f32.partialorder %v405_v2, 11.0 }
  0x33   :  { %v112_v34 = vadd.f32 %v110_v28, %v106_v30  ;;  %v95_v53 = vadd.f32 %v93_v47, %v89_v49  ;;  %v117_v63 = vsel %vm115_vm14, 6.828712, %v380_v4  ;;  %v164_v0 = vsel %vm162_vm15, 4.189655, %v380_v4 }
  0x34   :  { %vm174_vm2 = vcmp.eq.f32.partialorder %v407_v3, 11.0  ;;  %vm127_vm3 = vcmp.eq.f32.partialorder %v427_v18, 7.0  ;;  %v123_v6 = vsel %vm121_vm0, 6.6745615, %v380_v4  ;;  %v170_v7 = vsel %vm168_vm1, 2.4849067, %v380_v4 }
  0x35   :  { %v118_v38 = vadd.f32 %v116_v32, %v112_v34  ;;  %v101_v57 = vadd.f32 %v99_v51, %v95_v53  ;;  %vm133_vm4 = vcmp.eq.f32.partialorder %v425_v17, 8.0  ;;  %v176_v10 = vsel %vm174_vm2, 2.4849067, %v380_v4 }
  0x36   :  { %v184_v11 = vmul.f32 -1.609438, %v405_v2  ;;  %v129_v12 = vsel %vm127_vm3, 6.6745615, %v380_v4  ;;  %v200_v13 = vmul.f32 0.33647224, %v405_v2 }
  0x37   :  { %v124_v42 = vadd.f32 %v122_v36, %v118_v38  ;;  %v107_v61 = vadd.f32 %v105_v55, %v101_v57  ;;  %v216_v14 = vmul.f32 -0.6931472, %v405_v2  ;;  %vm139_vm5 = vcmp.eq.f32.partialorder %v427_v18, 8.0 }
  0x38   :  { %v232_v19 = vmul.f32 1.609438, %v405_v2  ;;  %v135_v20 = vsel %vm133_vm4, 6.204558, %v380_v4  ;;  %vm145_vm6 = vcmp.eq.f32.partialorder %v425_v17, 9.0  ;;  %v236_v26 = vmul.f32 0.0, %v407_v3 }
  0x39   :  { %v130_v46 = vadd.f32 %v128_v40, %v124_v42  ;;  %v113_v1 = vadd.f32 %v111_v59, %v107_v61  ;;  %v188_v21 = vmul.f32 -0.33647224, %v407_v3  ;;  %v204_v22 = vmul.f32 -1.0986123, %v407_v3 }
  0x3a   :  { %v220_v23 = vmul.f32 1.0986123, %v407_v3  ;;  %v141_v27 = vsel %vm139_vm5, 6.204558, %v380_v4  ;;  %vm151_vm7 = vcmp.eq.f32.partialorder %v427_v18, 9.0  ;;  %vm157_vm8 = vcmp.eq.f32.partialorder %v425_v17, 10.0 }
  0x3b   :  { %v136_v50 = vadd.f32 %v134_v44, %v130_v46  ;;  %v119_v8 = vadd.f32 %v117_v63, %v113_v1  ;;  %v147_v2 = vsel %vm145_vm6, 5.3936276, %v380_v4  ;;  %v153_v34 = vsel %vm151_vm7, 5.3936276, %v380_v4 }
  0x3c   :  { %vm163_vm9 = vcmp.eq.f32.partialorder %v427_v18, 10.0  ;;  %v159_v39 = vsel %vm157_vm8, 4.189655, %v380_v4  ;;  %vm169_vm10 = vcmp.eq.f32.partialorder %v425_v17, 11.0  ;;  %vm175_vm11 = vcmp.eq.f32.partialorder %v427_v18, 11.0 }
  0x3d   :  { %v142_v54 = vadd.f32 %v140_v48, %v136_v50  ;;  %v125_v15 = vadd.f32 %v123_v6, %v119_v8  ;;  %v165_v45 = vsel %vm163_vm9, 4.189655, %v380_v4  ;;  %v171_v51 = vsel %vm169_vm10, 2.4849067, %v380_v4 }
  0x3e   :  { %v177_v53 = vsel %vm175_vm11, 2.4849067, %v380_v4  ;;  %v201_v55 = vmul.f32 0.33647224, %v425_v17  ;;  %v217_v57 = vmul.f32 -0.6931472, %v425_v17 }
  0x3f   :  { %v148_v58 = vadd.f32 %v146_v52, %v142_v54  ;;  %v131_v24 = vadd.f32 %v129_v12, %v125_v15  ;;  %v185_v54 = vmul.f32 -1.609438, %v425_v17  ;;  %v189_v59 = vmul.f32 -0.33647224, %v427_v18 }
  0x40   :  { %v205_v61 = vmul.f32 -1.0986123, %v427_v18  ;;  %v237_v63 = vmul.f32 0.0, %v427_v18 }
  0x41   :  { %v154_v62 = vadd.f32 %v152_v56, %v148_v58  ;;  %v137_v28 = vadd.f32 %v135_v20, %v131_v24  ;;  %v233_v58 = vmul.f32 1.609438, %v425_v17 }
  0x43   :  { %v160_v5 = vadd.f32 %v158_v60, %v154_v62  ;;  %v143_v33 = vadd.f32 %v141_v27, %v137_v28  ;;  %v221_v62 = vmul.f32 1.0986123, %v427_v18 }
  0x45   :  { %v166_v9 = vadd.f32 %v164_v0, %v160_v5  ;;  %v149_v38 = vadd.f32 %v147_v2, %v143_v33 }
  0x47   :  { %v172_v16 = vadd.f32 %v170_v7, %v166_v9  ;;  %v155_v44 = vadd.f32 %v153_v34, %v149_v38 }
  0x49   :  { %v178_v25 = vadd.f32 %v176_v10, %v172_v16  ;;  %v161_v50 = vadd.f32 %v159_v39, %v155_v44 }
  0x4b   :  { %v186_v29 = vadd.f32 %v184_v11, %v178_v25  ;;  %v202_v30 = vadd.f32 %v200_v13, %v178_v25  ;;  %v218_v31 = vadd.f32 %v216_v14, %v178_v25  ;;  %v234_v32 = vadd.f32 %v232_v19, %v178_v25 }
  0x4c   :  { %v167_v52 = vadd.f32 %v165_v45, %v161_v50 }
  0x4d   :  { %v190_v35 = vadd.f32 %v188_v21, %v186_v29  ;;  %v206_v3 = vadd.f32 %v204_v22, %v202_v30  ;;  %v222_v36 = vadd.f32 %v220_v23, %v218_v31  ;;  %v238_v37 = vadd.f32 %v236_v26, %v234_v32 }
  0x4e   :  { %v173_v56 = vadd.f32 %v171_v51, %v167_v52 }
  0x4f   :  { %v192_v40 = vadd.f32 -10.042111, %v190_v35  ;;  %v208_v41 = vadd.f32 -15.344104, %v206_v3  ;;  %v224_v42 = vadd.f32 -22.887407, %v222_v36 }
  0x50   :  { %v240_v43 = vadd.f32 -31.205173, %v238_v37  ;;  %v179_v60 = vadd.f32 %v177_v53, %v173_v56 }
  0x51   :  { %v194_v46 = vmul.f32 1.442695, %v192_v40  ;;  %v210_v47 = vmul.f32 1.442695, %v208_v41  ;;  %v226_v48 = vmul.f32 1.442695, %v224_v42 }
  0x52   :  { %v242_v49 = vmul.f32 1.442695, %v240_v43  ;;  %v187_v4 = vadd.f32 %v185_v54, %v179_v60  ;;  %v203_v0 = vadd.f32 %v201_v55, %v179_v60  ;;  %v219_v1 = vadd.f32 %v217_v57, %v179_v60 }
  0x53   :  { %290 = vpow2.f32 %v194_v46  ;;  %v235_v5 = vadd.f32 %v233_v58, %v179_v60 }
  0x54   :  { %292 = vpow2.f32 %v210_v47  ;;  %v191_v6 = vadd.f32 %v189_v59, %v187_v4  ;;  %v207_v7 = vadd.f32 %v205_v61, %v203_v0  ;;  %v223_v8 = vadd.f32 %v221_v62, %v219_v1 }
  0x55   :  { %294 = vpow2.f32 %v226_v48  ;;  %v239_v9 = vadd.f32 %v237_v63, %v235_v5 }
  0x56   :  { %296 = vpow2.f32 %v242_v49  ;;  %v193_v10 = vadd.f32 -10.042111, %v191_v6  ;;  %v209_v11 = vadd.f32 -15.344104, %v207_v7  ;;  %v225_v17 = vadd.f32 -22.887407, %v223_v8 }
  0x57   :  { %v241_v12 = vadd.f32 -31.205173, %v239_v9 }
  0x58   :  { %v196_v14 = vmul.f32 1.442695, %v193_v10  ;;  %v212_v15 = vmul.f32 1.442695, %v209_v11  ;;  %v228_v16 = vmul.f32 1.442695, %v225_v17 }
  0x59   :  { %v244_v20 = vmul.f32 1.442695, %v241_v12 }
  0x5a   :  { %298 = vpow2.f32 %v196_v14 }
  0x5b   :  { %300 = vpow2.f32 %v212_v15 }
  0x5c   :  { %302 = vpow2.f32 %v228_v16 }
  0x5d   :  { %304 = vpow2.f32 %v244_v20 }
  0x60   :  { %v291_v13 = vpop.eup %290 }
  0x61   :  { %v293_v19 = vpop.eup %292 }
  0x62   :  { %v295_v21 = vpop.eup %294  ;;  %v214_v18 = vadd.f32 %v293_v19, %v291_v13 }
  0x63   :  { %v297_v22 = vpop.eup %296 }
  0x64   :  { %v230_v23 = vadd.f32 %v295_v21, %v214_v18 }
  0x66   :  { %v246_v24 = vadd.f32 %v297_v22, %v230_v23 }
  0x67   :  { %v299_v26 = vpop.eup %298 }
  0x68   :  { %v248_v25 = vadd.f32 1e-10, %v246_v24  ;;  %v301_v27 = vpop.eup %300 }
  0x69   :  { %v303_v28 = vpop.eup %302  ;;  %v215_v2 = vadd.f32 %v301_v27, %v299_v26 }
  0x6a   :  { %306 = vlog2.f32 %v248_v25  ;;  %v305_v29 = vpop.eup %304 }
  0x6b   :  { %v231_v30 = vadd.f32 %v303_v28, %v215_v2 }
  0x6d   :  { %v247_v31 = vadd.f32 %v305_v29, %v231_v30 }
  0x6f   :  { %v249_v33 = vadd.f32 1e-10, %v247_v31 }
  0x71   :  { %308 = vlog2.f32 %v249_v33 }
  0x77   :  { %v307_v32 = vpop.eup %306 }
  0x78   :  { %v251_v34 = vmul.f32 0.6931472, %v307_v32 }
  0x7a   :  { %254 = vst [vmem:[#allocation7] sm:$0xff] %v251_v34 }
  0x7e   :  { %v309_v35 = vpop.eup %308 }
  0x7f   :  { %v253_v3 = vmul.f32 0.6931472, %v309_v35 }
  0x81   :  { %255 = vst [vmem:[#allocation7 + $0x8] sm:$0xff] %v253_v3 }
  0x82   :  { %361 = shalt.err (!%p358_p0)
}
  0x83   :  { %s382_s22 = smov 128   ;;  %s383_s23 = smov 8  }
  0x84   :  { %267 = dma.vmem_to_hbm [thread:$0]  %s262_s1, 256, %s524_s2, [#allocation4], %s382_s22, %s382_s22, %s383_s23  }
  0x85   :  { %374 = dma.done.wait [#allocation4], 256  }
  0x86   :  { %375 = vsyncadd [#allocation4], 4294967040 }
  0x87   :  { %271 = vsyncpa [#allocation3], 1 }
  0x88   :  { %272 = vsyncpa [#allocation6], 1 }
  0x89   :  { %273 = vsyncpa [#allocation4], 1 }

</bundles_post_ra>
